<compile_context>
chip_gen: v7x
topology: tpu7x:2x2x1
jax: 0.10.0
libtpu: 0.0.40
codegen_flags: <defaults>
</compile_context>

<pallas_src>
import functools

import jax
import jax.numpy as jnp
from jax import lax
from jax.experimental import pallas as pl
from jax.experimental.pallas import tpu as pltpu

HIDDEN = 32  # DCRNN out_channels


# ---------------------------------------------------------------------------
# Pallas kernel: fused DCRNN cell (H0 = 0) + ReLU + Linear(32 -> 1),
# nodes-on-lanes layout, in-kernel x-tile transpose via dot_general.
# ---------------------------------------------------------------------------
def _recurrent_gcn_kernel(x_ref, wg_ref, bg_ref, wl_ref, bl_ref, o_ref,
                          *, gate_dtype):
    f32 = jnp.float32

    # x tile is (TM, F) straight from HBM.  Contract both last dims so the
    # fused gate pre-activations land nodes-on-lanes: (2H, F) x (TM, F)^T
    # -> (2H, TM), accumulated in f32 on the MXU.
    g = lax.dot_general(
        wg_ref[...], x_ref[...],
        dimension_numbers=(((1,), (1,)), ((), ())),
        preferred_element_type=f32) + bg_ref[...]

    # Optionally run the transcendentals in bf16 (EUP is the binding unit for
    # large N on v6e/v7x); product and everything downstream stay f32.
    gz = g[:HIDDEN, :].astype(gate_dtype)          # update-gate pre-act (H, TM)
    gh = g[HIDDEN:, :].astype(gate_dtype)          # candidate pre-act   (H, TM)

    # H0 == 0  =>  H_new = (1 - sigmoid(g_z)) * tanh(g_h)
    #                    = sigmoid(-g_z) * tanh(g_h)          (exact identity)
    h_new = jax.nn.sigmoid(-gz).astype(f32) * jnp.tanh(gh).astype(f32)
    h_relu = jnp.maximum(h_new, 0.0)               # ReLU(H_new)         (H, TM)

    # Linear(32 -> 1): (1, H) @ (H, TM) + b -> (1, TM), lane-dense store.
    y = jnp.dot(wl_ref[...], h_relu, preferred_element_type=f32) + bl_ref[0, 0]
    o_ref[...] = y.astype(o_ref.dtype)


# ---------------------------------------------------------------------------
# Tile selection: amortize per-grid-step overhead, keep >= 2 parallel steps
# for v7x megacore, stay lane-aligned, respect VMEM across generations.
# ---------------------------------------------------------------------------
def _pick_node_tile(n, cap=8192):
    if n < 256:
        return n                       # single full-array tile (always legal)
    half = (n // 2) // 128 * 128       # >= 2 lane-aligned parallel grid steps
    return max(128, min(cap, half))


# ---------------------------------------------------------------------------
# Wrapper: parameter packing (plain JAX glue) + pallas_call
# ---------------------------------------------------------------------------
def recurrent_gcn_forward(x, edge_index, edge_weight, params, *, tm=None,
                          input_dtype=jnp.float32, gate_dtype=jnp.float32):
    # K=1 diffusion conv ignores the graph (order-0 term only; see header).
    del edge_index, edge_weight

    n, f = x.shape
    if tm is None:
        tm = _pick_node_tile(n)

    # Pad N up to a tile multiple; padded rows are computed then discarded.
    n_pad = ((n + tm - 1) // tm) * tm
    if n_pad != n:
        x = jnp.pad(x, ((0, n_pad - n), (0, 0)))
    x = x.astype(input_dtype)

    def dconv_x_weight(w):
        # w: (2, 1, F + HIDDEN, HIDDEN); K=1 order-0 term sums both diffusion
        # directions.  Only the X-part of the [X, H] concat survives (H0 == 0).
        wsum = w[0, 0] + w[1, 0]
        return wsum[:f, :]                                   # (F, HIDDEN)

    # Fuse z-gate and candidate weights into one (2H, F) left operand.
    wg = jnp.concatenate(
        [dconv_x_weight(params["W_z"]).T,
         dconv_x_weight(params["W_h"]).T], axis=0).astype(input_dtype)  # (2H, F)
    bg = jnp.concatenate(
        [params["b_z"], params["b_h"]]).reshape(2 * HIDDEN, 1)          # (2H, 1)
    wl_t = params["W_lin"].T.astype(jnp.float32)             # (1, HIDDEN)
    bl = params["b_lin"].reshape(1, 1).astype(jnp.float32)   # scalar -> SMEM

    # VMEM budget: double-buffered x tile + (1,TM) out + f32 intermediates
    # (g 64 rows, gates/h_relu 3x32 rows ~ 640 B/node col; use 1 KiB slack).
    x_bytes = jnp.dtype(input_dtype).itemsize
    est = tm * (2 * f * x_bytes + 8 + 1024) + (2 << 20)
    vmem_limit = int(min(max(est, 32 << 20), 64 << 20))

    full_spec = lambda shape: pl.BlockSpec(shape, lambda i: (0, 0))

    grid_spec = pltpu.PrefetchScalarGridSpec(
        num_scalar_prefetch=0,
        grid=(n_pad // tm,),
        in_specs=[
            pl.BlockSpec((tm, f), lambda i: (i, 0)),            # x node tile (no HBM transpose)
            full_spec(wg.shape),                                # fused gate weights
            full_spec(bg.shape),                                # fused gate biases
            full_spec(wl_t.shape),                              # linear head weight
            pl.BlockSpec(memory_space=pltpu.MemorySpace.SMEM),  # linear head bias
        ],
        out_specs=pl.BlockSpec((1, tm), lambda i: (0, i)),      # lane-dense output
    )

    out_t = pl.pallas_call(
        functools.partial(_recurrent_gcn_kernel, gate_dtype=gate_dtype),
        out_shape=jax.ShapeDtypeStruct((1, n_pad), jnp.float32),
        grid_spec=grid_spec,
        compiler_params=pltpu.CompilerParams(
            dimension_semantics=("parallel",),
            vmem_limit_bytes=vmem_limit),
    )(x, wg, bg, wl_t, bl)

    return out_t[:, :n].T                                      # (N, 1)


# ---------------------------------------------------------------------------
# Deterministic parameter init (shapes from the module's __init__)
# ---------------------------------------------------------------------------
def init_params(key, node_features):
    fin = node_features + HIDDEN  # DConv input channels = in + out (gate concat)
    ks = jax.random.split(key, 5)

    def glorot(k, shape):
        fan_in, fan_out = shape[-2], shape[-1]
        lim = (6.0 / (fan_in + fan_out)) ** 0.5
        return jax.random.uniform(k, shape, jnp.float32, -lim, lim)

    params = {}
    for name, k in zip(("z", "r", "h"), ks[:3]):
        params[f"W_{name}"] = glorot(k, (2, 1, fin, HIDDEN))  # DConv weight (2, K, in, out)
        params[f"b_{name}"] = jnp.zeros((HIDDEN,), jnp.float32)
    lim = 1.0 / (HIDDEN ** 0.5)
    params["W_lin"] = jax.random.uniform(ks[3], (HIDDEN, 1), jnp.float32, -lim, lim)
    params["b_lin"] = jax.random.uniform(ks[4], (1,), jnp.float32, -lim, lim)
    return params


# Pure-JAX reference of the PyTorch forward (full DCRNN cell, no simplification).
def reference_forward(x, params):
    n, _ = x.shape
    h = jnp.zeros((n, HIDDEN), jnp.float32)

    def dconv(inp, w, b):
        return inp @ (w[0, 0] + w[1, 0]) + b

    z = jax.nn.sigmoid(dconv(jnp.concatenate([x, h], axis=1), params["W_z"], params["b_z"]))
    r = jax.nn.sigmoid(dconv(jnp.concatenate([x, h], axis=1), params["W_r"], params["b_r"]))
    h_tilde = jnp.tanh(dconv(jnp.concatenate([x, h * r], axis=1), params["W_h"], params["b_h"]))
    h_new = z * h + (1.0 - z) * h_tilde
    return jnp.maximum(h_new, 0.0) @ params["W_lin"] + params["b_lin"]


if __name__ == "__main__":
    key = jax.random.PRNGKey(0)
    kx, kw = jax.random.split(key, 2)

    N, F = 64, 4  # num_nodes, node_features
    x = jax.random.normal(kx, (N, F), jnp.float32)

    # Simple ring graph (unused by the K=1 forward, kept for interface fidelity).
    src = jnp.arange(N, dtype=jnp.int32)
    edge_index = jnp.stack([src, (src + 1) % N])
    edge_weight = jnp.ones((N,), jnp.float32)

    params = init_params(kw, F)
    ref = reference_forward(x, params)

    # 1) f32 path (bit-faithful to the PyTorch module).
    out = recurrent_gcn_forward(x, edge_index, edge_weight, params)
    out = jax.block_until_ready(out)
    assert out.shape == (N, 1)
    assert jnp.allclose(out, ref, atol=1e-5, rtol=1e-5), "f32 kernel mismatch vs reference"

    # 2) bf16 fast path (halved x/wg HBM stream, bf16 EUP gates); looser tolerance.
    out_bf16 = recurrent_gcn_forward(x, edge_index, edge_weight, params,
                                     input_dtype=jnp.bfloat16,
                                     gate_dtype=jnp.bfloat16)
    out_bf16 = jax.block_until_ready(out_bf16)
    assert jnp.allclose(out_bf16, ref, atol=5e-2, rtol=5e-2), "bf16 kernel mismatch vs reference"

    # 3) Ragged / multi-tile path (grid >= 2 parallel steps, tail padding).
    N2 = 300
    x2 = jax.random.normal(jax.random.PRNGKey(1), (N2, F), jnp.float32)
    out2 = recurrent_gcn_forward(x2, edge_index, edge_weight, params)
    out2 = jax.block_until_ready(out2)
    ref2 = reference_forward(x2, params)
    assert out2.shape == (N2, 1)
    assert jnp.allclose(out2, ref2, atol=1e-5, rtol=1e-5), "multi-tile kernel mismatch vs reference"

    print("KERNEL_OK")
</pallas_src>

<mosaic_0001>
module attributes {stable_mosaic.version = 11 : i64} {
  func.func @_recurrent_gcn_kernel(%arg0: i32, %arg1: memref<64x4xf32, #tpu.memory_space<vmem>>, %arg2: memref<64x4xf32, #tpu.memory_space<vmem>>, %arg3: memref<64x1xf32, #tpu.memory_space<vmem>>, %arg4: memref<1x32xf32, #tpu.memory_space<vmem>>, %arg5: memref<1x1xf32, #tpu.memory_space<smem>>, %arg6: memref<1x64xf32, #tpu.memory_space<vmem>>) attributes {dimension_semantics = [#tpu.dimension_semantics<parallel>], iteration_bounds = array<i64: 1>, scalar_prefetch = 0 : i64, scratch_operands = 0 : i64, tpu.core_type = #tpu.core_type<tc>, window_params = [{transform_indices = @transform_0, window_bounds = array<i64: 64, 4>}, {pipeline_mode = #tpu.pipeline_mode<synchronous>, transform_indices = @transform_1, window_bounds = array<i64: 64, 4>}, {pipeline_mode = #tpu.pipeline_mode<synchronous>, transform_indices = @transform_2, window_bounds = array<i64: 64, 1>}, {pipeline_mode = #tpu.pipeline_mode<synchronous>, transform_indices = @transform_3, window_bounds = array<i64: 1, 32>}, {transform_indices = @transform_4, window_bounds = array<i64: 1, 1>}, {transform_indices = @transform_5, window_bounds = array<i64: 1, 64>}]} {
    %c0 = arith.constant 0 : index
    %c0_0 = arith.constant 0 : index
    %0 = vector.load %arg2[%c0, %c0_0] : memref<64x4xf32, #tpu.memory_space<vmem>>, vector<64x4xf32>
    %c0_1 = arith.constant 0 : index
    %c0_2 = arith.constant 0 : index
    %1 = vector.load %arg1[%c0_1, %c0_2] : memref<64x4xf32, #tpu.memory_space<vmem>>, vector<64x4xf32>
    %cst = arith.constant dense<0.000000e+00> : vector<64x64xf32>
    %2 = tpu.matmul %0, %1, %cst {dimension_numbers = #tpu.dot_dimension_numbers<[1], [1], [0], [0], [0, 0, 1, 0], [], []>} : vector<64x4xf32>, vector<64x4xf32>, vector<64x64xf32> -> vector<64x64xf32>
    %c0_3 = arith.constant 0 : index
    %c0_4 = arith.constant 0 : index
    %3 = vector.load %arg3[%c0_3, %c0_4] : memref<64x1xf32, #tpu.memory_space<vmem>>, vector<64x1xf32>
    %4 = vector.broadcast %3 : vector<64x1xf32> to vector<64x64xf32>
    %5 = arith.addf %2, %4 : vector<64x64xf32>
    %6 = vector.extract_strided_slice %5 {offsets = [0, 0], sizes = [32, 64], strides = [1, 1]} : vector<64x64xf32> to vector<32x64xf32>
    %7 = vector.extract_strided_slice %5 {offsets = [32, 0], sizes = [32, 64], strides = [1, 1]} : vector<64x64xf32> to vector<32x64xf32>
    %cst_5 = arith.constant 0.000000e+00 : f32
    %8 = vector.broadcast %cst_5 : f32 to vector<32x64xf32>
    %9 = arith.subf %8, %6 : vector<32x64xf32>
    %10 = arith.negf %9 : vector<32x64xf32>
    %11 = math.exp %10 : vector<32x64xf32>
    %cst_6 = arith.constant 1.000000e+00 : f32
    %12 = vector.broadcast %cst_6 : f32 to vector<32x64xf32>
    %13 = arith.addf %12, %11 : vector<32x64xf32>
    %14 = arith.divf %12, %13 : vector<32x64xf32>
    %15 = math.tanh %7 : vector<32x64xf32>
    %16 = arith.mulf %14, %15 : vector<32x64xf32>
    %cst_7 = arith.constant 0.000000e+00 : f32
    %17 = vector.broadcast %cst_7 : f32 to vector<32x64xf32>
    %18 = arith.maximumf %16, %17 : vector<32x64xf32>
    %c0_8 = arith.constant 0 : index
    %c0_9 = arith.constant 0 : index
    %19 = vector.load %arg4[%c0_8, %c0_9] : memref<1x32xf32, #tpu.memory_space<vmem>>, vector<1x32xf32>
    %cst_10 = arith.constant dense<0.000000e+00> : vector<1x64xf32>
    %20 = tpu.matmul %19, %18, %cst_10 {dimension_numbers = #tpu.dot_dimension_numbers<[1], [0], [0], [1], [0, 0, 1, 1], [], []>} : vector<1x32xf32>, vector<32x64xf32>, vector<1x64xf32> -> vector<1x64xf32>
    %c0_11 = arith.constant 0 : index
    %c0_12 = arith.constant 0 : index
    %21 = memref.load %arg5[%c0_11, %c0_12] : memref<1x1xf32, #tpu.memory_space<smem>>
    %22 = vector.broadcast %21 : f32 to vector<1x64xf32>
    %23 = arith.addf %20, %22 : vector<1x64xf32>
    %c0_13 = arith.constant 0 : index
    %c0_14 = arith.constant 0 : index
    %24 = vector.load %arg6[%c0_13, %c0_14] : memref<1x64xf32, #tpu.memory_space<vmem>>, vector<1x64xf32>
    tpu.vector_store %arg6[%c0_13, %c0_14], %23 {strides = array<i32>} : memref<1x64xf32, #tpu.memory_space<vmem>>, vector<1x64xf32>,
    return
  }
  func.func @transform_0(%arg0: i32) -> (i32, i32) {
    %c0_i32 = arith.constant 0 : i32
    %c0_i32_0 = arith.constant 0 : i32
    return %arg0, %c0_i32 : i32, i32
  }
  func.func @transform_1(%arg0: i32) -> (i32, i32) {
    %c0_i32 = arith.constant 0 : i32
    %c0_i32_0 = arith.constant 0 : i32
    %c0_i32_1 = arith.constant 0 : i32
    return %c0_i32, %c0_i32_0 : i32, i32
  }
  func.func @transform_2(%arg0: i32) -> (i32, i32) {
    %c0_i32 = arith.constant 0 : i32
    %c0_i32_0 = arith.constant 0 : i32
    %c0_i32_1 = arith.constant 0 : i32
    return %c0_i32, %c0_i32_0 : i32, i32
  }
  func.func @transform_3(%arg0: i32) -> (i32, i32) {
    %c0_i32 = arith.constant 0 : i32
    %c0_i32_0 = arith.constant 0 : i32
    %c0_i32_1 = arith.constant 0 : i32
    return %c0_i32, %c0_i32_0 : i32, i32
  }
  func.func @transform_4(%arg0: i32) -> (i32, i32) {
    %c0_i32 = arith.constant 0 : i32
    %c0_i32_0 = arith.constant 0 : i32
    %c0_i32_1 = arith.constant 0 : i32
    return %c0_i32, %c0_i32_0 : i32, i32
  }
  func.func @transform_5(%arg0: i32) -> (i32, i32) {
    %c0_i32 = arith.constant 0 : i32
    %c0_i32_0 = arith.constant 0 : i32
    return %c0_i32, %arg0 : i32, i32
  }
}

</mosaic_0001>

<bundles_post_ra>
// kernel: tpu_custom_call.1
= control target key start
LH: loop header
LB: loop body
LE: loop exit
PB: predicated region body
PF: predicated region fallthrough
CT: control target
= control target key end

     0   :  { %vm86_vm0 = vcmask 31744   ;;  %v539_v6 = vmov 0   ;;  %s696_s0 = inlined_call_operand.vmem [shape: f32[64,4], index: 0, kind: input, shape index: {}]   ;;  %s697_s1 = inlined_call_operand.vmem [shape: f32[64,4], index: 1, kind: input, shape index: {}]   ;;  %s698_s2 = inlined_call_operand.vmem [shape: f32[64,1], index: 2, kind: input, shape index: {}]   ;;  %s699_s3 = inlined_call_operand.vmem [shape: f32[1,32], index: 3, kind: input, shape index: {}]   ;;  %s700_s4 = inlined_call_operand.<no memory space> [shape: f32[1,1], index: 4, kind: input, shape index: {}]   ;;  %s701_s5 = inlined_call_operand.hbm [shape: f32[1,64], index: 5, kind: output, shape index: {}]  }
   0x1   :  { %v30_v0 = vld [vmem:[%s696_s0] sm:$0xff]  ;;  %v31_v1 = vld [vmem:[%s696_s0 + $0x8] sm:$0xff]  ;;  %v32_v2 = vld [vmem:[%s696_s0 + $0x10] sm:$0xff]  ;;  %489 = vset.pattern.permute.xlu0 %v539_v6  ;;  %490 = vset.pattern.permute.xlu1 %v539_v6 }
   0x2   :  { %v454_v3 = vpack.c.bf16 %v31_v1, %v30_v0  ;;  %vm585_vm1 = vmpackc.low %vm86_vm0, %vm86_vm0  ;;  %v33_v5 = vld [vmem:[%s696_s0 + $0x18] sm:$0xff]  ;;  %v22_v8 = vld [vmem:[%s697_s1] sm:$0xff] }
   0x3   :  { %v460_v7 = vpack.c.bf16 %v33_v5, %v32_v2  ;;  %431 = vmatprep.mubr.msk.f32.mxu0 %vm86_vm0, %v22_v8  ;;  %v38_v9 = vld [vmem:[%s698_s2] sm:$0xff]  ;;  %v35_v11 = vld [vmem:[%s696_s0 + $0x28] sm:$0xff]  ;;  %v40_v12 = vld [vmem:[%s698_s2 + $0x10] sm:$0xff] }
   0x4   :  { %456 = vmatprep.subr.msk.bf16.mxu0 %vm585_vm1, %v454_v3  ;;  %v34_v10 = vld [vmem:[%s696_s0 + $0x20] sm:$0xff]  ;;  %48 = vperm.xlu0 %489, %v38_v9   ;;  %v39_v13 = vld [vmem:[%s698_s2 + $0x8] sm:$0xff]  ;;  %v41_v14 = vld [vmem:[%s698_s2 + $0x18] sm:$0xff] }
   0x5   :  { %459 = vmatpush3.bf16.xpose.msk.msra.mxu0 %vm585_vm1, %v454_v3  ;;  %58 = vperm.xlu1 %490, %v40_v12  }
   0x6   :  { %462 = vmatprep.subr.msk.bf16.mxu0 %vm585_vm1, %v460_v7 }
   0x7   :  { %11 = vsyncpa [#allocation4], 0  ;;  %v466_v15 = vpack.c.bf16 %v35_v11, %v34_v10  ;;  %v42_v16 = vld [vmem:[%s698_s2 + $0x20] sm:$0xff]  ;;  %v43_v17 = vld [vmem:[%s698_s2 + $0x28] sm:$0xff]  ;;  %v540_v30 = vmov 0.0|0.0   ;;  %vm541_vm2 = vmmov 0  }
   0x8   :  { %53 = vperm.xlu0 %489, %v39_v13   ;;  %v36_v18 = vld [vmem:[%s696_s0 + $0x30] sm:$0xff]  ;;  %v37_v19 = vld [vmem:[%s696_s0 + $0x38] sm:$0xff]  ;;  %v23_v23 = vld [vmem:[%s697_s1 + $0x8] sm:$0xff]  ;;  %478 = vmatprep.subr.bf16.mxu1 %v540_v30  ;;  %v542_v31 = vmov 0.0   ;;  %vm283_vm3 = vcmask 261120   ;;  %s543_s17 = smov [#allocation3]  }
   0x9   :  { %63 = vperm.xlu1 %490, %v41_v14   ;;  %v44_v20 = vld [vmem:[%s698_s2 + $0x30] sm:$0xff]  ;;  %v45_v21 = vld [vmem:[%s698_s2 + $0x38] sm:$0xff]  ;;  %v472_v22 = vpack.c.bf16 %v37_v19, %v36_v18  ;;  %v26_v26 = vld [vmem:[%s697_s1 + $0x20] sm:$0xff]  ;;  %451 = vmatprep.mubr.msk.f32.mxu1 %vm541_vm2, %v542_v31  ;;  %s365_s18 = sshll.u32 %s543_s17, 4  ;;  %vm357_vm4 = vcmask 516096   ;;  %s366_s18 = int_to_ptr.vmem [resolvable:$true] %s365_s18 }
   0xa   :  { %v24_v24 = vld [vmem:[%s697_s1 + $0x10] sm:$0xff]  ;;  %v25_v25 = vld [vmem:[%s697_s1 + $0x18] sm:$0xff]  ;;  %v27_v27 = vld [vmem:[%s697_s1 + $0x28] sm:$0xff]  ;;  %s515_s19 = scalar_lea.vmem %s366_s18, 16  ;;  %s519_s20 = scalar_lea.vmem %s366_s18, 32 }
   0xb   :  { %v28_v28 = vld [vmem:[%s697_s1 + $0x30] sm:$0xff]  ;;  %v29_v29 = vld [vmem:[%s697_s1 + $0x38] sm:$0xff]  ;;  %p516_p0 = scmp.ne.s32.totalorder %s366_s18, %s515_s19  ;;  %p520_p1 = scmp.lt.s32.totalorder %s366_s18, %s366_s18 }
   0xc   :  { %68 = vperm.xlu0 %489, %v42_v16   ;;  %p521_p2 = scmp.lt.s32.totalorder %s519_s20, %s515_s19 }
   0xd   :  { %465 = vmatpush3.bf16.xpose.msk.msra.mxu0 %vm585_vm1, %v460_v7  ;;  %73 = vperm.xlu1 %490, %v43_v17  }
   0xe   :  { %468 = vmatprep.subr.msk.bf16.mxu0 %vm585_vm1, %v466_v15  ;;  %p522_p3 = por %p521_p2, %p520_p1 }
  0x10   :  { %78 = vperm.xlu0 %489, %v44_v20   ;;  %p523_p4 = pnand %p522_p3, %p516_p0 }
  0x11   :  { %83 = vperm.xlu1 %490, %v45_v21  }
  0x15   :  { %471 = vmatpush3.bf16.xpose.msk.msra.mxu0 %vm585_vm1, %v466_v15 }
  0x16   :  { %474 = vmatprep.subr.msk.bf16.mxu0 %vm585_vm1, %v472_v22 }
  0x1d   :  { %477 = vmatpush3.bf16.xpose.msk.msra.mxu0 %vm585_vm1, %v472_v22 }
  0x24   :  { %432 = vmatmul.mubr.msk.f32.vlgmr.msra.gmra.mrb[0].mxu0 %vm86_vm0, %v23_v23 }
  0x25   :  { %434 = vmatprep.mubr.msk.f32.mxu0 %vm86_vm0, %v24_v24 }
  0x28   :  { %435 = vmatmul.mubr.msk.f32.gmra.mrb[2].mxu0 %vm86_vm0, %v25_v25 }
  0x29   :  { %437 = vmatprep.mubr.msk.f32.mxu0 %vm86_vm0, %v26_v26  ;;  %v280_v26 = vld [vmem:[%s699_s3] sm:$0x1] }
  0x2c   :  { %438 = vmatmul.mubr.msk.f32.gmra.mrb[4].mxu0 %vm86_vm0, %v27_v27  ;;  %v282_v27 = vstv %s700_s4 }
  0x2d   :  { %440 = vmatprep.mubr.msk.f32.mxu0 %vm86_vm0, %v28_v28 }
  0x30   :  { %441 = vmatmul.mubr.msk.f32.gmra.mrb[6].mxu0 %vm86_vm0, %v29_v29 }
  0x83   :  { %v49_v32 = vpop.permute.xlu0 %48 }
  0x84   :  { %v59_v33 = vpop.permute.xlu1 %58 }
  0x87   :  { %v54_v34 = vpop.permute.xlu0 %53 }
  0x88   :  { %v64_v40 = vpop.permute.xlu1 %63 }
  0x8b   :  { %v69_v55 = vpop.permute.xlu0 %68 }
  0x8c   :  { %v74_v54 = vpop.permute.xlu1 %73 }
  0x8f   :  { %v79_v63 = vpop.permute.xlu0 %78 }
  0x90   :  { %v84_v61 = vpop.permute.xlu1 %83 }
  0xf7   :  { %v433_v35 = vpop.f32.mrb[0].mxu0 }
  0xf8   :  { %v207_v36 = vadd.f32 %v433_v35, %v54_v34  ;;  %v201_v37 = vpop.f32.mrb[1].mxu0 }
  0xf9   :  { %v202_v38 = vadd.f32 %v201_v37, %v49_v32 }
  0xfa   :  { %v241_v39 = vsub.f32 0.0, %v207_v36 }
  0xfb   :  { %v240_v41 = vsub.f32 0.0, %v202_v38  ;;  %v436_v42 = vpop.f32.mrb[2].mxu0 }
  0xfc   :  { %v390_v43 = vmul.f32 -1.442695, %v241_v39  ;;  %v217_v44 = vadd.f32 %v436_v42, %v64_v40  ;;  %v211_v45 = vpop.f32.mrb[3].mxu0 }
  0xfd   :  { %v389_v46 = vmul.f32 -1.442695, %v240_v41  ;;  %v212_v47 = vadd.f32 %v211_v45, %v59_v33 }
  0xfe   :  { %491 = vpow2.f32 %v390_v43  ;;  %v243_v48 = vsub.f32 0.0, %v217_v44 }
  0xff   :  { %493 = vpow2.f32 %v389_v46  ;;  %v242_v49 = vsub.f32 0.0, %v212_v47  ;;  %v439_v50 = vpop.f32.mrb[4].mxu0 }
 0x100   :  { %v392_v51 = vmul.f32 -1.442695, %v243_v48  ;;  %v221_v52 = vpop.f32.mrb[5].mxu0  ;;  %v227_v58 = vadd.f32 %v439_v50, %v74_v54 }
 0x101   :  { %v391_v53 = vmul.f32 -1.442695, %v242_v49  ;;  %v222_v59 = vadd.f32 %v221_v52, %v69_v55 }
 0x102   :  { %495 = vpow2.f32 %v392_v51 }
 0x103   :  { %497 = vpow2.f32 %v391_v53  ;;  %v442_v56 = vpop.f32.mrb[6].mxu0 }
 0x104   :  { %v231_v57 = vpop.f32.mrb[7].mxu0  ;;  %499 = vtanh.f32 %v227_v58  ;;  %v237_v1 = vadd.f32 %v442_v56, %v84_v61 }
 0x105   :  { %501 = vtanh.f32 %v222_v59  ;;  %v232_v3 = vadd.f32 %v231_v57, %v79_v63 }
 0x108   :  { %v492_v60 = vpop.eup %491 }
 0x109   :  { %v494_v62 = vpop.eup %493  ;;  %v257_v0 = vadd.f32 1.0, %v492_v60 }
 0x10a   :  { %v256_v2 = vadd.f32 1.0, %v494_v62 }
 0x10b   :  { %503 = vrcp.f32 %v257_v0 }
 0x10c   :  { %v496_v4 = vpop.eup %495  ;;  %505 = vrcp.f32 %v256_v2 }
 0x10d   :  { %v498_v5 = vpop.eup %497  ;;  %v259_v6 = vadd.f32 1.0, %v496_v4  ;;  %507 = vtanh.f32 %v237_v1 }
 0x10e   :  { %v258_v7 = vadd.f32 1.0, %v498_v5  ;;  %509 = vtanh.f32 %v232_v3  ;;  %v500_v8 = vpop.eup %499 }
 0x10f   :  { %511 = vrcp.f32 %v259_v6  ;;  %v502_v9 = vpop.eup %501 }
 0x110   :  { %513 = vrcp.f32 %v258_v7 }
 0x115   :  { %v504_v10 = vpop.eup %503 }
 0x116   :  { %v506_v11 = vpop.eup %505  ;;  %v273_v12 = vmul.f32 %v504_v10, %v500_v8 }
 0x117   :  { %v508_v13 = vpop.eup %507  ;;  %v272_v14 = vmul.f32 %v506_v11, %v502_v9 }
 0x118   :  { %v510_v15 = vpop.eup %509  ;;  %v277_v16 = vmax.f32 %v273_v12, 0.0 }
 0x119   :  { %v512_v17 = vpop.eup %511  ;;  %v276_v18 = vmax.f32 %v272_v14, 0.0 }
 0x11a   :  { %v514_v19 = vpop.eup %513  ;;  %v275_v20 = vmul.f32 %v512_v17, %v508_v13 }
 0x11b   :  { %v479_v21 = vpack.c.bf16 %v277_v16, %v276_v18  ;;  %v274_v22 = vmul.f32 %v514_v19, %v510_v15 }
 0x11c   :  { %v279_v23 = vmax.f32 %v275_v20, 0.0 }
 0x11d   :  { %480 = vmatpush3.bf16.msra.mxu1 %v479_v21  ;;  %v278_v24 = vmax.f32 %v274_v22, 0.0 }
 0x11e   :  { %481 = vmatprep.subr.bf16.mxu1 %v540_v30 }
 0x11f   :  { %v482_v25 = vpack.c.bf16 %v279_v23, %v278_v24 }
 0x121   :  { %483 = vmatpush3.bf16.msra.mxu1 %v482_v25 }
 0x124   :  { %452 = vmatmul.mubr.msk.f32.vlgmr.msra.gmra.mrb[0].mxu1 %vm283_vm3, %v280_v26 }
 0x1f7   :  { %v353_v28 = vpop.f32.mrb[0].mxu1 }
 0x1f8   :  { %v354_v29 = vadd.f32 %v353_v28, %v282_v27  ;;  %v453_v31 = vpop.f32.mrb[1].mxu1 }
 0x1fa   :  { %358 = vst.msk [vmem:[#allocation3] sm:$0x1] %vm357_vm4, %v354_v29 }
 0x1fb   :  { %526 = shalt.err (!%p523_p4)
}
 0x1fc   :  { %s527_s4 = scalar_lea.hbm %s701_s5, 16 }
 0x1fd   :  { %p528_p5 = scmp.ne.s32.totalorder %s701_s5, %s527_s4  ;;  %p531_p6 = scmp.lt.u32.totalorder %s527_s4, %s701_s5 }
 0x1ff   :  { %p533_p7 = pnand %p531_p6, %p528_p5 }
 0x201   :  { %536 = shalt.err (!%p533_p7)
}
 0x202   :  { %368 = dma.vmem_to_hbm [thread:$0]  %s366_s18, 16, %s701_s5, [#allocation4]  }
 0x203   :  { %537 = dma.done.wait [#allocation4], 16  }
 0x204   :  { %538 = vsyncadd [#allocation4], 4294967280 }
 0x205   :  { %372 = vsyncpa [#allocation4], 1 }

</bundles_post_ra>
